<compile_context>
chip_gen: v6e
topology: v6e:2x2x1
jax: 0.10.0
libtpu: 0.0.40
codegen_flags: <defaults>
</compile_context>

<pallas_src>
import jax
import jax.numpy as jnp
from jax.experimental import pallas as pl
from jax.experimental.pallas import tpu as pltpu


def _round_up(x, m):
    return (x + m - 1) // m * m


def _qnet_kernel(x_ref, w1_ref, b1_ref, w2_ref, b2_ref, o_ref):
    # In-kernel operand cast (no-op for f32, free VPU work for bf16).
    x = x_ref[...].astype(w1_ref.dtype)
    # hidden = relu(x @ W1 + b1); bias add in f32 (broadcast over sublanes).
    h = jnp.dot(x, w1_ref[...], preferred_element_type=jnp.float32)
    h = jnp.maximum(h + b1_ref[...], 0.0)
    # out = hidden @ W2 + b2; keep only the real O output lanes (narrow store).
    y = jnp.dot(h.astype(w2_ref.dtype), w2_ref[...],
                preferred_element_type=jnp.float32)
    o = y[:, :o_ref.shape[-1]] + b2_ref[...]
    o_ref[...] = o.astype(o_ref.dtype)


def prepare_params(w1, b1, w2, b2, compute_dtype=jnp.float32):
    """Lane-pad weights (hidden dim -> 128) once; biases stay f32.

    Inputs (stored [in, out], i.e. pre-transposed vs nn.Linear):
      w1: [I, H], b1: [H], w2: [H, O], b2: [O]
    Returns:
      w1_p: [I, Hp] (compute_dtype), b1_p: [1, Hp] (f32),
      w2_p: [Hp, Op] (compute_dtype), b2_p: [1, O] (f32)
    Padded hidden units see zero weights and zero bias -> contribute nothing.
    """
    I, H = w1.shape
    H2, O = w2.shape
    assert H2 == H
    Hp = _round_up(H, 128)
    Op = _round_up(O, 128)
    w1_p = jnp.zeros((I, Hp), compute_dtype).at[:, :H].set(
        w1.astype(compute_dtype))
    b1_p = jnp.zeros((1, Hp), jnp.float32).at[0, :H].set(
        b1.astype(jnp.float32))
    w2_p = jnp.zeros((Hp, Op), compute_dtype).at[:H, :O].set(
        w2.astype(compute_dtype))
    b2_p = b2.astype(jnp.float32).reshape(1, O)
    return w1_p, b1_p, w2_p, b2_p


def linear_qnet_forward(x, w1, b1, w2, b2, *, compute_dtype=jnp.float32,
                        batch_tile=2048):
    """x: [B, I]; w1: [I, H]; b1: [H]; w2: [H, O]; b2: [O] -> [B, O] float32.

    batch_tile=2048 keeps double-buffered tiles ~4 MiB (inside v5e's 16 MiB
    scoped-VMEM default); raise vmem_limit_bytes if you push it to 4096 on v5e.
    """
    assert batch_tile > 0 and batch_tile % 8 == 0, "batch_tile must be a multiple of 8"
    B, I = x.shape
    O = w2.shape[1]

    w1_p, b1_p, w2_p, b2_p = prepare_params(w1, b1, w2, b2, compute_dtype)
    Hp = w1_p.shape[1]
    Op = w2_p.shape[1]

    if B <= batch_tile:
        # Small batch: single un-pipelined invocation, everything VMEM-resident.
        return pl.pallas_call(
            _qnet_kernel,
            out_shape=jax.ShapeDtypeStruct((B, O), jnp.float32),
            in_specs=[pl.BlockSpec(memory_space=pltpu.MemorySpace.VMEM)] * 5,
            out_specs=pl.BlockSpec(memory_space=pltpu.MemorySpace.VMEM),
        )(x, w1_p, b1_p, w2_p, b2_p)

    # Large batch: tile over batch only. Pick the tile adaptively so the grid
    # has an even number of steps (v7x megacore balance) and at most ~7 wasted
    # rows per step; no jnp.pad of x -- Pallas masks the ragged last block.
    steps = pl.cdiv(B, batch_tile)
    if steps > 1:
        steps = _round_up(steps, 2)
    TB = _round_up(pl.cdiv(B, steps), 8)
    grid = (pl.cdiv(B, TB),)

    return pl.pallas_call(
        _qnet_kernel,
        out_shape=jax.ShapeDtypeStruct((B, O), jnp.float32),
        grid=grid,
        in_specs=[
            pl.BlockSpec((TB, I), lambda i: (i, 0)),   # x: batch-tiled, no lane pad
            pl.BlockSpec((I, Hp), lambda i: (0, 0)),   # W1: VMEM-resident
            pl.BlockSpec((1, Hp), lambda i: (0, 0)),   # b1
            pl.BlockSpec((Hp, Op), lambda i: (0, 0)),  # W2
            pl.BlockSpec((1, O), lambda i: (0, 0)),    # b2
        ],
        out_specs=pl.BlockSpec((TB, O), lambda i: (i, 0)),  # narrow real output
        compiler_params=pltpu.CompilerParams(
            dimension_semantics=("parallel",)),
    )(x, w1_p, b1_p, w2_p, b2_p)


def reference_forward(x, w1, b1, w2, b2):
    hp = jax.lax.Precision.HIGHEST
    h = jnp.maximum(jnp.dot(x, w1, precision=hp) + b1, 0.0)
    return jnp.dot(h, w2, precision=hp) + b2


if __name__ == "__main__":
    # LinearQNet(inputSize=11, hiddenSize=32, outputSize=3); batch=8.
    inputSize, hiddenSize, outputSize = 11, 32, 3
    batch = 8

    key = jax.random.PRNGKey(0)
    kx, kw1, kb1, kw2, kb2 = jax.random.split(key, 5)

    x = jax.random.normal(kx, (batch, inputSize), dtype=jnp.float32)
    # Deterministic synthetic parameters (nn.Linear-like scale), stored [in, out].
    w1 = jax.random.uniform(kw1, (inputSize, hiddenSize), dtype=jnp.float32,
                            minval=-1.0, maxval=1.0) / jnp.sqrt(inputSize)
    b1 = jax.random.uniform(kb1, (hiddenSize,), dtype=jnp.float32,
                            minval=-1.0, maxval=1.0) / jnp.sqrt(inputSize)
    w2 = jax.random.uniform(kw2, (hiddenSize, outputSize), dtype=jnp.float32,
                            minval=-1.0, maxval=1.0) / jnp.sqrt(hiddenSize)
    b2 = jax.random.uniform(kb2, (outputSize,), dtype=jnp.float32,
                            minval=-1.0, maxval=1.0) / jnp.sqrt(hiddenSize)

    ref = reference_forward(x, w1, b1, w2, b2)

    # 1) f32 path, small batch (no grid, no pipeline).
    out = linear_qnet_forward(x, w1, b1, w2, b2)
    jax.block_until_ready(out)
    assert out.shape == (batch, outputSize)
    assert jnp.allclose(out, ref, atol=1e-4, rtol=1e-4)

    # 2) bf16-operand path (in-kernel cast; f32 MXU accumulation + f32 biases).
    out_bf16 = linear_qnet_forward(x, w1, b1, w2, b2,
                                   compute_dtype=jnp.bfloat16)
    jax.block_until_ready(out_bf16)
    assert out_bf16.shape == (batch, outputSize)
    assert jnp.allclose(out_bf16, ref, atol=1.5e-1, rtol=5e-2)

    # 3) batch-tiled path (weights VMEM-resident, batch axis parallel); use a
    #    small batch_tile so the grid path (adaptive even #steps + ragged last
    #    block, no padding) is actually exercised.
    big_batch = 1064
    xb = jax.random.normal(kx, (big_batch, inputSize), dtype=jnp.float32)
    out_big = linear_qnet_forward(xb, w1, b1, w2, b2, batch_tile=256)
    jax.block_until_ready(out_big)
    ref_big = reference_forward(xb, w1, b1, w2, b2)
    assert out_big.shape == (big_batch, outputSize)
    assert jnp.allclose(out_big, ref_big, atol=1e-4, rtol=1e-4)

    print("KERNEL_OK")
</pallas_src>

<mosaic_0001>
module attributes {stable_mosaic.version = 11 : i64} {
  func.func @_qnet_kernel(%arg0: memref<8x11xf32, #tpu.memory_space<vmem>>, %arg1: memref<11x128xf32, #tpu.memory_space<vmem>>, %arg2: memref<1x128xf32, #tpu.memory_space<vmem>>, %arg3: memref<128x128xf32, #tpu.memory_space<vmem>>, %arg4: memref<1x3xf32, #tpu.memory_space<vmem>>, %arg5: memref<8x3xf32, #tpu.memory_space<vmem>>) attributes {dimension_semantics = [], scalar_prefetch = 0 : i64, scratch_operands = 0 : i64, tpu.core_type = #tpu.core_type<tc>} {
    %c0 = arith.constant 0 : index
    %c0_0 = arith.constant 0 : index
    %0 = vector.load %arg0[%c0, %c0_0] : memref<8x11xf32, #tpu.memory_space<vmem>>, vector<8x11xf32>
    %c0_1 = arith.constant 0 : index
    %c0_2 = arith.constant 0 : index
    %1 = vector.load %arg1[%c0_1, %c0_2] : memref<11x128xf32, #tpu.memory_space<vmem>>, vector<11x128xf32>
    %cst = arith.constant dense<0.000000e+00> : vector<8x128xf32>
    %2 = tpu.matmul %0, %1, %cst {dimension_numbers = #tpu.dot_dimension_numbers<[1], [0], [0], [1], [0, 0, 1, 1], [], []>} : vector<8x11xf32>, vector<11x128xf32>, vector<8x128xf32> -> vector<8x128xf32>
    %c0_3 = arith.constant 0 : index
    %c0_4 = arith.constant 0 : index
    %3 = vector.load %arg2[%c0_3, %c0_4] : memref<1x128xf32, #tpu.memory_space<vmem>>, vector<1x128xf32>
    %4 = vector.broadcast %3 : vector<1x128xf32> to vector<8x128xf32>
    %5 = arith.addf %2, %4 : vector<8x128xf32>
    %cst_5 = arith.constant 0.000000e+00 : f32
    %6 = vector.broadcast %cst_5 : f32 to vector<8x128xf32>
    %7 = arith.maximumf %5, %6 : vector<8x128xf32>
    %c0_6 = arith.constant 0 : index
    %c0_7 = arith.constant 0 : index
    %8 = vector.load %arg3[%c0_6, %c0_7] : memref<128x128xf32, #tpu.memory_space<vmem>>, vector<128x128xf32>
    %cst_8 = arith.constant dense<0.000000e+00> : vector<8x128xf32>
    %9 = tpu.matmul %7, %8, %cst_8 {dimension_numbers = #tpu.dot_dimension_numbers<[1], [0], [0], [1], [0, 0, 1, 1], [], []>} : vector<8x128xf32>, vector<128x128xf32>, vector<8x128xf32> -> vector<8x128xf32>
    %10 = vector.extract_strided_slice %9 {offsets = [0, 0], sizes = [8, 3], strides = [1, 1]} : vector<8x128xf32> to vector<8x3xf32>
    %c0_9 = arith.constant 0 : index
    %c0_10 = arith.constant 0 : index
    %11 = vector.load %arg4[%c0_9, %c0_10] : memref<1x3xf32, #tpu.memory_space<vmem>>, vector<1x3xf32>
    %12 = vector.broadcast %11 : vector<1x3xf32> to vector<8x3xf32>
    %13 = arith.addf %10, %12 : vector<8x3xf32>
    %c0_11 = arith.constant 0 : index
    %c0_12 = arith.constant 0 : index
    %14 = vector.load %arg5[%c0_11, %c0_12] : memref<8x3xf32, #tpu.memory_space<vmem>>, vector<8x3xf32>
    tpu.vector_store %arg5[%c0_11, %c0_12], %13 {strides = array<i32>} : memref<8x3xf32, #tpu.memory_space<vmem>>, vector<8x3xf32>,
    return
  }
}

</mosaic_0001>

<bundles_post_ra>
// kernel: tpu_custom_call.1
= control target key start
LH: loop header
LB: loop body
LE: loop exit
PB: predicated region body
PF: predicated region fallthrough
CT: control target
= control target key end

     0   :  { %10 = vsyncpa [#allocation3], 0  ;;  %s442_s0 = inlined_call_operand.hbm [shape: f32[8,11], index: 0, kind: input, shape index: {}]   ;;  %s443_s1 = inlined_call_operand.hbm [shape: f32[11,128], index: 1, kind: input, shape index: {}]   ;;  %s444_s2 = inlined_call_operand.vmem [shape: f32[1,128], index: 2, kind: input, shape index: {}]   ;;  %s445_s3 = inlined_call_operand.hbm [shape: f32[128,128], index: 3, kind: input, shape index: {}]   ;;  %s446_s4 = inlined_call_operand.vmem [shape: f32[1,3], index: 4, kind: input, shape index: {}]   ;;  %s447_s5 = inlined_call_operand.vmem [shape: f32[8,3], index: 5, kind: output, shape index: {}]  }
   0x1   :  { %11 = vsyncpa [#allocation5], 0  ;;  %s387_s18 = smov [#allocation4]  }
   0x2   :  { %s27_s19 = sshll.u32 %s387_s18, 4  ;;  %s28_s19 = int_to_ptr.vmem [resolvable:$true] %s27_s19 }
   0x3   :  { %s331_s20 = scalar_lea.vmem %s28_s19, 256  ;;  %p336_p1 = scmp.lt.s32.totalorder %s28_s19, %s28_s19 }
   0x4   :  { %p332_p0 = scmp.ne.s32.totalorder %s28_s19, %s331_s20  ;;  %p337_p2 = scmp.lt.s32.totalorder %s331_s20, %s331_s20 }
   0x6   :  { %p338_p3 = por %p337_p2, %p336_p1 }
   0x8   :  { %p339_p4 = pnand %p338_p3, %p332_p0 }
   0xa   :  { %342 = shalt.err (!%p339_p4)
}
   0xb   :  { %s388_s21 = smov 128   ;;  %s389_s22 = smov 8  }
   0xc   :  { %33 = dma.hbm_to_vmem [thread:$0]  %s443_s1, 256, %s28_s19, [#allocation5], %s388_s21, %s388_s21, %s389_s22  }
   0xd   :  { %s390_s25 = smov [#allocation2]   ;;  %s391_s27 = smov [#allocation6]  }
   0xe   :  { %s18_s26 = sshll.u32 %s390_s25, 4  ;;  %s41_s28 = sshll.u32 %s391_s27, 4  ;;  %s19_s26 = int_to_ptr.vmem [resolvable:$true] %s18_s26  ;;  %s42_s28 = int_to_ptr.vmem [resolvable:$true] %s41_s28 }
   0xf   :  { %s351_s29 = scalar_lea.vmem %s19_s26, 128  ;;  %p356_p6 = scmp.lt.s32.totalorder %s19_s26, %s19_s26 }
  0x10   :  { %p352_p5 = scmp.ne.s32.totalorder %s19_s26, %s351_s29  ;;  %p357_p7 = scmp.lt.s32.totalorder %s351_s29, %s351_s29 }
  0x12   :  { %p358_p8 = por %p357_p7, %p356_p6 }
  0x14   :  { %p359_p9 = pnand %p358_p8, %p352_p5 }
  0x16   :  { %362 = shalt.err (!%p359_p9)
}
  0x17   :  { %21 = dma.hbm_to_vmem [thread:$0]  %s442_s0, 128, %s19_s26, [#allocation3]  }
  0x18   :  { %s371_s7 = scalar_lea.vmem %s42_s28, 2048  ;;  %p376_p11 = scmp.lt.s32.totalorder %s42_s28, %s42_s28 }
  0x19   :  { %p372_p10 = scmp.ne.s32.totalorder %s42_s28, %s371_s7  ;;  %p377_p12 = scmp.lt.s32.totalorder %s371_s7, %s371_s7 }
  0x1b   :  { %p378_p13 = por %p377_p12, %p376_p11 }
  0x1d   :  { %p379_p0 = pnand %p378_p13, %p372_p10 }
  0x1f   :  { %382 = shalt.err (!%p379_p0)
}
  0x20   :  { %47 = dma.hbm_to_vmem [thread:$0]  %s445_s3, 2048, %s42_s28, [#allocation5], %s388_s21, %s388_s21, %s389_s22  }
  0x21   :  { %383 = dma.done.wait [#allocation3], 128  }
  0x22   :  { %384 = vsyncadd [#allocation3], 4294967168 }
  0x23   :  { %385 = dma.done.wait [#allocation5], 2304  }
  0x24   :  { %386 = vsyncadd [#allocation5], 4294964992  ;;  %v392_v0 = vmov 0.0   ;;  %vm393_vm0 = vmmov 0   ;;  %vm73_vm1 = vcmask 1042432   ;;  %v60_v2 = vld [vmem:[#allocation4] sm:$0xff] }
  0x25   :  { %274 = vmatprep.subr.mxu0 %v392_v0  ;;  %278 = vmatprep.mubr.msk.f32.mxu0 %vm393_vm0, %v392_v0  ;;  %v61_v1 = vld [vmem:[#allocation4 + $0x8] sm:$0x7]  ;;  %v59_v3 = vld [vmem:[#allocation2] sm:$0xff]  ;;  %vm69_vm2 = vcmask 89088   ;;  %v162_v5 = vld [vmem:[#allocation6 + $0x70] sm:$0xff]  ;;  %vm242_vm3 = vcmask 23552  }
  0x26   :  { %281 = vmatprep.subr.mxu1 %v392_v0  ;;  %313 = vmatprep.mubr.msk.f32.mxu1 %vm393_vm0, %v392_v0  ;;  %v163_v4 = vld [vmem:[#allocation6 + $0x78] sm:$0xff]  ;;  %v161_v6 = vld [vmem:[#allocation6 + $0x68] sm:$0xff]  ;;  %v160_v7 = vld [vmem:[#allocation6 + $0x60] sm:$0xff] }
  0x27   :  { %275 = vmatpush3.msk.msra.mxu0 %vm73_vm1, %v61_v1  ;;  %282 = vmatpush3.msra.mxu1 %v163_v4  ;;  %v159_v8 = vld [vmem:[#allocation6 + $0x58] sm:$0xff]  ;;  %v158_v9 = vld [vmem:[#allocation6 + $0x50] sm:$0xff]  ;;  %v157_v10 = vld [vmem:[#allocation6 + $0x48] sm:$0xff] }
  0x28   :  { %276 = vmatprep.subr.mxu0 %v392_v0  ;;  %283 = vmatprep.subr.mxu1 %v392_v0  ;;  %v156_v11 = vld [vmem:[#allocation6 + $0x40] sm:$0xff]  ;;  %v155_v12 = vld [vmem:[#allocation6 + $0x38] sm:$0xff]  ;;  %v154_v13 = vld [vmem:[#allocation6 + $0x30] sm:$0xff] }
  0x29   :  { %277 = vmatpush3.msra.mxu0 %v60_v2  ;;  %284 = vmatpush3.msra.mxu1 %v162_v5  ;;  %v153_v14 = vld [vmem:[#allocation6 + $0x28] sm:$0xff]  ;;  %v152_v15 = vld [vmem:[#allocation6 + $0x20] sm:$0xff]  ;;  %v151_v16 = vld [vmem:[#allocation6 + $0x18] sm:$0xff] }
  0x2a   :  { %279 = vmatmul.mubr.msk.f32.vlgmr.msra.gmra.mxu0 %vm69_vm2, %v59_v3  ;;  %285 = vmatprep.subr.mxu1 %v392_v0  ;;  %v150_v17 = vld [vmem:[#allocation6 + $0x10] sm:$0xff]  ;;  %v149_v18 = vld [vmem:[#allocation6 + $0x8] sm:$0xff]  ;;  %v148_v19 = vld [vmem:[#allocation6] sm:$0xff] }
  0x2b   :  { %286 = vmatpush3.msra.mxu1 %v161_v6  ;;  %v250_v20 = vld [vmem:[%s444_s2] ss:$0 sm:$0xff] }
  0x2c   :  { %287 = vmatprep.subr.mxu1 %v392_v0  ;;  %v253_v25 = vld [vmem:[%s446_s4] ss:$0 sm:$0xff] }
  0x2d   :  { %288 = vmatpush3.msra.mxu1 %v160_v7 }
  0x2e   :  { %289 = vmatprep.subr.mxu1 %v392_v0 }
  0x2f   :  { %290 = vmatpush3.msra.mxu1 %v159_v8 }
  0x30   :  { %291 = vmatprep.subr.mxu1 %v392_v0 }
  0x31   :  { %292 = vmatpush3.msra.mxu1 %v158_v9 }
  0x32   :  { %293 = vmatprep.subr.mxu1 %v392_v0 }
  0x33   :  { %294 = vmatpush3.msra.mxu1 %v157_v10 }
  0x34   :  { %295 = vmatprep.subr.mxu1 %v392_v0 }
  0x35   :  { %296 = vmatpush3.msra.mxu1 %v156_v11 }
  0x36   :  { %297 = vmatprep.subr.mxu1 %v392_v0 }
  0x37   :  { %298 = vmatpush3.msra.mxu1 %v155_v12 }
  0x38   :  { %299 = vmatprep.subr.mxu1 %v392_v0 }
  0x39   :  { %300 = vmatpush3.msra.mxu1 %v154_v13 }
  0x3a   :  { %301 = vmatprep.subr.mxu1 %v392_v0 }
  0x3b   :  { %302 = vmatpush3.msra.mxu1 %v153_v14 }
  0x3c   :  { %303 = vmatprep.subr.mxu1 %v392_v0 }
  0x3d   :  { %304 = vmatpush3.msra.mxu1 %v152_v15 }
  0x3e   :  { %305 = vmatprep.subr.mxu1 %v392_v0 }
  0x3f   :  { %306 = vmatpush3.msra.mxu1 %v151_v16 }
  0x40   :  { %307 = vmatprep.subr.mxu1 %v392_v0 }
  0x41   :  { %308 = vmatpush3.msra.mxu1 %v150_v17 }
  0x42   :  { %309 = vmatprep.subr.mxu1 %v392_v0 }
  0x43   :  { %310 = vmatpush3.msra.mxu1 %v149_v18 }
  0x44   :  { %311 = vmatprep.subr.mxu1 %v392_v0 }
  0x45   :  { %312 = vmatpush3.msra.mxu1 %v148_v19 }
  0xea   :  { %v143_v21 = vpop.f32.mrf.mxu0 }
  0xeb   :  { %v144_v22 = vadd.f32 %v250_v20, %v143_v21 }
  0xec   :  { %v280_v23 = vpop.f32.mrf.mxu0 }
  0xed   :  { %v147_v24 = vmax.f32 %v144_v22, 0.0 }
  0xef   :  { %314 = vmatmul.mubr.f32.vlgmr.msra.gmra.mxu1 %v147_v24 }
 0x1af   :  { %v230_v26 = vpop.f32.mrf.mxu1 }
 0x1b0   :  { %v241_v27 = vadd.f32 %v253_v25, %v230_v26 }
 0x1b1   :  { %v315_v28 = vpop.f32.mrf.mxu1 }
 0x1b2   :  { %243 = vst.msk [vmem:[%s447_s5] sm:$0xff] %vm242_vm3, %v241_v27 }
 0x1b3   :  { %248 = vsyncpa [#allocation3], 1 }
 0x1b4   :  { %249 = vsyncpa [#allocation5], 1 }

</bundles_post_ra>
